<compile_context>
chip_gen: v6e
topology: v6e:2x2x1
jax: 0.10.0
libtpu: 0.0.40
codegen_flags: <defaults>
</compile_context>

<pallas_src>
import numpy as np
import jax
import jax.numpy as jnp
from jax.experimental import pallas as pl
from jax.experimental.pallas import tpu as pltpu

# ----------------------------- model config ---------------------------------
N_JOINTS = 8                     # n
INPUT_DIM = 3 * N_JOINTS         # 24
F0, F1, F2 = 32, 32, N_JOINTS    # FC_layers (last must equal n)
C1 = 4                           # Conv_layers_RELU out channels
C2 = 8                           # Conv_layers out channels (== dim_layer_a)
OUTPUT_DIM = 3                   # m
BATCH = 4
EPS = 1e-5
LANES = 128


# ----------------------- one-time constant packing ---------------------------
def build_constant_slab(params):
    """Pack all constant operands into one (R, 128) f32 slab (host-side, once).

    Every matrix starts on an 8-row boundary, columns are left-aligned and
    zero-padded to 128 lanes, so a single DMA moves every weight to VMEM.
    Returns (slab, offsets) with offsets[name] = (row0, n_rows, n_cols).
    """
    n = N_JOINTS
    eye_n = np.eye(n, dtype=np.float32)
    ones_n = np.ones((n,), np.float32)
    ones_nn = np.ones((n, n), np.float32)
    p = {k: np.asarray(v, np.float32) for k, v in params.items()}

    # FC_in weight widened to all 3n input columns (cols 2n:3n unused -> zero).
    w_in = np.zeros((3 * n, F0), np.float32)
    w_in[:2 * n, :] = p['W_in'].T

    # 1x1 conv as matmul on the (B, C*n) channel-block-lanes layout.
    m1 = np.kron(p['Wc1'].T, eye_n)              # (3n, C1*n)
    # conv input channels: [x_in[:, n:2n], h, x_in[:, 2n:3n]]
    m1_x = np.zeros((3 * n, C1 * n), np.float32)
    m1_x[n:2 * n, :] = m1[0:n, :]                # x_in[:, n:2n]  -> channel 0
    m1_x[2 * n:, :] = m1[2 * n:, :]              # x_in[:, 2n:3n] -> channel 2
    m1_mid = m1[n:2 * n, :]                      # h              -> channel 1

    a_big = np.kron(p['aw'][:, None], eye_n[:, :OUTPUT_DIM])        # (C2*n, m)
    a_big = np.pad(a_big, ((0, 0), (0, LANES - OUTPUT_DIM)))        # lane-dense

    pieces = [
        ('w_in',   w_in),
        ('b_in',   p['b_in'][None, :]),
        ('w_h0',   p['W_h0'].T),
        ('b_h0',   p['b_h0'][None, :]),
        ('w_h1',   p['W_h1'].T),
        ('b_h1',   p['b_h1'][None, :]),
        ('m1_x',   m1_x),
        ('m1_mid', m1_mid),
        ('b1',     np.kron(p['bc1'], ones_n)[None, :]),
        ('k1',     np.kron(np.eye(C1, dtype=np.float32), ones_nn)),  # block-ones
        ('m2',     np.kron(p['Wc2'].T, eye_n)),
        ('b2',     np.kron(p['bc2'], ones_n)[None, :]),
        ('k2',     np.kron(np.eye(C2, dtype=np.float32), ones_nn)),
        ('abig',   a_big),
    ]

    offsets, rows, r = {}, [], 0
    for name, mat in pieces:
        k, ncol = mat.shape
        kp = -(-k // 8) * 8                       # pad rows to multiple of 8
        buf = np.zeros((kp, LANES), np.float32)
        buf[:k, :ncol] = mat
        offsets[name] = (r, k, ncol)
        rows.append(buf)
        r += kp
    slab = np.concatenate(rows, axis=0)           # (352, 128) ~= 176 KiB
    return jnp.asarray(slab), offsets


# ------------------------------- kernel --------------------------------------
def make_mainnet_kernel(offsets, batch):
    inv_cnt = 1.0 / float(batch * N_JOINTS)       # BN count = B * H * W = B*n*1

    def kernel(x_ref, slab_ref, out_ref):
        f32 = jnp.float32

        def w(name):                               # static ref-view into the slab
            r, k, ncol = offsets[name]
            return slab_ref[r:r + k, 0:ncol]

        x = x_ref[...]                                                 # (B, 3n)

        # ---- FC stack (three MXU matmuls) + relu ----
        h = jnp.maximum(jnp.dot(x, w('w_in'), preferred_element_type=f32)
                        + w('b_in'), 0.0)
        h = jnp.maximum(jnp.dot(h, w('w_h0'), preferred_element_type=f32)
                        + w('b_h0'), 0.0)
        h = jnp.maximum(jnp.dot(h, w('w_h1'), preferred_element_type=f32)
                        + w('b_h1'), 0.0)                              # (B, n)

        # ---- Conv_RELU (1x1): two independent matmuls into one accumulator
        #      (x-part is independent of the FC chain; MRB-accumulated on v7x).
        #      MaxPool2d(1) == identity.
        o1 = (jnp.dot(x, w('m1_x'), preferred_element_type=f32)
              + jnp.dot(h, w('m1_mid'), preferred_element_type=f32)
              + w('b1'))
        o1 = jnp.maximum(o1, 0.0)                                      # (B, C1*n)

        # ---- BatchNorm1: fused stats — one (2, C*n) matmul vs block-ones ----
        s1 = jnp.sum(o1, axis=0, keepdims=True)
        q1 = jnp.sum(o1 * o1, axis=0, keepdims=True)
        stats1 = jnp.dot(jnp.concatenate([s1, q1], axis=0) * inv_cnt, w('k1'),
                         preferred_element_type=f32)                   # (2, C1*n)
        mean1 = stats1[0:1, :]
        var1 = stats1[1:2, :] - mean1 * mean1
        o1n = (o1 - mean1) * jax.lax.rsqrt(var1 + EPS)

        # ---- Conv_last (1x1) as matmul ----
        o2 = jnp.dot(o1n, w('m2'), preferred_element_type=f32) + w('b2')

        # ---- BatchNorm2 (MaxPool2d(1) == identity) ----
        s2 = jnp.sum(o2, axis=0, keepdims=True)
        q2 = jnp.sum(o2 * o2, axis=0, keepdims=True)
        stats2 = jnp.dot(jnp.concatenate([s2, q2], axis=0) * inv_cnt, w('k2'),
                         preferred_element_type=f32)                   # (2, C2*n)
        mean2 = stats2[0:1, :]
        var2 = stats2[1:2, :] - mean2 * mean2
        o2n = (o2 - mean2) * jax.lax.rsqrt(var2 + EPS)                 # (B, C2*n)

        # ---- A layer at spatial rows 0..m-1: one matmul, lane-dense store ----
        out_ref[...] = jnp.dot(o2n, w('abig'), preferred_element_type=f32)

    return kernel


# ------------------------------- wrapper --------------------------------------
def make_forward(offsets, batch):
    kernel = make_mainnet_kernel(offsets, batch)

    @jax.jit
    def forward(x_in, slab):
        # Gridless: whole resident set (~180 KiB) fits easily in VMEM on
        # v5e/v6e/v7x, and per-grid-step overhead would dominate at this size.
        # TODO(synk): if BATCH grows beyond ~8, add a parallel batch grid axis
        # (block multiple of 8, dimension_semantics=("parallel",)) so v7x's
        # second TensorCore gets work.
        out = pl.pallas_call(
            kernel,
            out_shape=jax.ShapeDtypeStruct((batch, LANES), jnp.float32),
            in_specs=[pl.BlockSpec(memory_space=pltpu.MemorySpace.VMEM),
                      pl.BlockSpec(memory_space=pltpu.MemorySpace.VMEM)],
            out_specs=pl.BlockSpec(memory_space=pltpu.MemorySpace.VMEM),
        )(x_in, slab)
        return out[:, :OUTPUT_DIM]

    return forward


# --------------------------- pure-JAX reference ------------------------------
def reference_forward(x_in, params):
    n = N_JOINTS
    h = jax.nn.relu(x_in[:, :2 * n] @ params['W_in'].T + params['b_in'])
    h = jax.nn.relu(h @ params['W_h0'].T + params['b_h0'])
    h = jax.nn.relu(h @ params['W_h1'].T + params['b_h1'])
    x_conv = jnp.stack([x_in[:, n:2 * n], h, x_in[:, 2 * n:]], axis=1)   # (B,3,n)
    x_conv = x_conv[..., None]                                           # NCHW
    o1 = jnp.einsum('bchw,oc->bohw', x_conv, params['Wc1']) \
        + params['bc1'][None, :, None, None]
    o1 = jax.nn.relu(o1)                                                 # pool(1)=id
    mu1 = o1.mean(axis=(0, 2, 3), keepdims=True)
    var1 = o1.var(axis=(0, 2, 3), keepdims=True)
    o1n = (o1 - mu1) / jnp.sqrt(var1 + EPS)
    o2 = jnp.einsum('bchw,oc->bohw', o1n, params['Wc2']) \
        + params['bc2'][None, :, None, None]
    mu2 = o2.mean(axis=(0, 2, 3), keepdims=True)
    var2 = o2.var(axis=(0, 2, 3), keepdims=True)
    o2n = (o2 - mu2) / jnp.sqrt(var2 + EPS)                              # pool(1)=id
    out_a = o2n[:, :, 0, 0] @ params['aw']
    out_b = o2n[:, :, 1, 0] @ params['aw']
    out_c = o2n[:, :, 2, 0] @ params['aw']
    return jnp.stack([out_a, out_b, out_c], axis=1)                      # (B, 3)


# ------------------------------ param init -----------------------------------
def init_params(key):
    keys = jax.random.split(key, 11)

    def u(k, shape, fan_in):
        bound = 1.0 / np.sqrt(fan_in)
        return jax.random.uniform(k, shape, jnp.float32, -bound, bound)

    return {
        'W_in': u(keys[0], (F0, 2 * N_JOINTS), 2 * N_JOINTS),
        'b_in': u(keys[1], (F0,), 2 * N_JOINTS),
        'W_h0': u(keys[2], (F1, F0), F0),
        'b_h0': u(keys[3], (F1,), F0),
        'W_h1': u(keys[4], (F2, F1), F1),
        'b_h1': u(keys[5], (F2,), F1),
        'Wc1':  u(keys[6], (C1, 3), 3),          # Conv_RELU.weight (C1,3,1,1) squeezed
        'bc1':  u(keys[7], (C1,), 3),
        'Wc2':  u(keys[8], (C2, C1), C1),        # Conv_last.weight (C2,C1,1,1) squeezed
        'bc2':  u(keys[9], (C2,), C1),
        'aw':   u(keys[10], (C2,), C2),          # A_layer.weight (1, C2) squeezed
    }


if __name__ == "__main__":
    key = jax.random.PRNGKey(0)
    pkey, xkey = jax.random.split(key)
    params = init_params(pkey)
    x_in = jax.random.normal(xkey, (BATCH, INPUT_DIM), jnp.float32)

    # One-time, host-side constant expansion + packing (outside the jit path).
    slab, offsets = build_constant_slab(jax.device_get(params))
    forward = make_forward(offsets, BATCH)

    out = jax.block_until_ready(forward(x_in, slab))

    ref = reference_forward(x_in, params)
    assert out.shape == (BATCH, OUTPUT_DIM)
    np.testing.assert_allclose(np.asarray(out), np.asarray(ref), rtol=1e-4, atol=1e-4)
    print("KERNEL_OK")
</pallas_src>

<mosaic_0001>
module attributes {stable_mosaic.version = 11 : i64} {
  func.func @kernel(%arg0: memref<4x24xf32, #tpu.memory_space<vmem>>, %arg1: memref<352x128xf32, #tpu.memory_space<vmem>>, %arg2: memref<4x128xf32, #tpu.memory_space<vmem>>) attributes {dimension_semantics = [], scalar_prefetch = 0 : i64, scratch_operands = 0 : i64, tpu.core_type = #tpu.core_type<tc>} {
    %c0 = arith.constant 0 : index
    %c0_0 = arith.constant 0 : index
    %0 = vector.load %arg0[%c0, %c0_0] : memref<4x24xf32, #tpu.memory_space<vmem>>, vector<4x24xf32>
    %c0_1 = arith.constant 0 : index
    %c0_2 = arith.constant 0 : index
    %1 = vector.load %arg1[%c0_1, %c0_2] : memref<352x128xf32, #tpu.memory_space<vmem>>, vector<24x32xf32>
    %cst = arith.constant dense<0.000000e+00> : vector<4x32xf32>
    %2 = tpu.matmul %0, %1, %cst {dimension_numbers = #tpu.dot_dimension_numbers<[1], [0], [0], [1], [0, 0, 1, 1], [], []>} : vector<4x24xf32>, vector<24x32xf32>, vector<4x32xf32> -> vector<4x32xf32>
    %c24 = arith.constant 24 : index
    %c0_3 = arith.constant 0 : index
    %3 = vector.load %arg1[%c24, %c0_3] : memref<352x128xf32, #tpu.memory_space<vmem>>, vector<1x32xf32>
    %4 = vector.broadcast %3 : vector<1x32xf32> to vector<4x32xf32>
    %5 = arith.addf %2, %4 : vector<4x32xf32>
    %cst_4 = arith.constant 0.000000e+00 : f32
    %6 = vector.broadcast %cst_4 : f32 to vector<4x32xf32>
    %7 = arith.maximumf %5, %6 : vector<4x32xf32>
    %c32 = arith.constant 32 : index
    %c0_5 = arith.constant 0 : index
    %8 = vector.load %arg1[%c32, %c0_5] : memref<352x128xf32, #tpu.memory_space<vmem>>, vector<32x32xf32>
    %cst_6 = arith.constant dense<0.000000e+00> : vector<4x32xf32>
    %9 = tpu.matmul %7, %8, %cst_6 {dimension_numbers = #tpu.dot_dimension_numbers<[1], [0], [0], [1], [0, 0, 1, 1], [], []>} : vector<4x32xf32>, vector<32x32xf32>, vector<4x32xf32> -> vector<4x32xf32>
    %c64 = arith.constant 64 : index
    %c0_7 = arith.constant 0 : index
    %10 = vector.load %arg1[%c64, %c0_7] : memref<352x128xf32, #tpu.memory_space<vmem>>, vector<1x32xf32>
    %11 = vector.broadcast %10 : vector<1x32xf32> to vector<4x32xf32>
    %12 = arith.addf %9, %11 : vector<4x32xf32>
    %cst_8 = arith.constant 0.000000e+00 : f32
    %13 = vector.broadcast %cst_8 : f32 to vector<4x32xf32>
    %14 = arith.maximumf %12, %13 : vector<4x32xf32>
    %c72 = arith.constant 72 : index
    %c0_9 = arith.constant 0 : index
    %15 = vector.load %arg1[%c72, %c0_9] : memref<352x128xf32, #tpu.memory_space<vmem>>, vector<32x8xf32>
    %cst_10 = arith.constant dense<0.000000e+00> : vector<4x8xf32>
    %16 = tpu.matmul %14, %15, %cst_10 {dimension_numbers = #tpu.dot_dimension_numbers<[1], [0], [0], [1], [0, 0, 1, 1], [], []>} : vector<4x32xf32>, vector<32x8xf32>, vector<4x8xf32> -> vector<4x8xf32>
    %c104 = arith.constant 104 : index
    %c0_11 = arith.constant 0 : index
    %17 = vector.load %arg1[%c104, %c0_11] : memref<352x128xf32, #tpu.memory_space<vmem>>, vector<1x8xf32>
    %18 = vector.broadcast %17 : vector<1x8xf32> to vector<4x8xf32>
    %19 = arith.addf %16, %18 : vector<4x8xf32>
    %cst_12 = arith.constant 0.000000e+00 : f32
    %20 = vector.broadcast %cst_12 : f32 to vector<4x8xf32>
    %21 = arith.maximumf %19, %20 : vector<4x8xf32>
    %c112 = arith.constant 112 : index
    %c0_13 = arith.constant 0 : index
    %22 = vector.load %arg1[%c112, %c0_13] : memref<352x128xf32, #tpu.memory_space<vmem>>, vector<24x32xf32>
    %cst_14 = arith.constant dense<0.000000e+00> : vector<4x32xf32>
    %23 = tpu.matmul %0, %22, %cst_14 {dimension_numbers = #tpu.dot_dimension_numbers<[1], [0], [0], [1], [0, 0, 1, 1], [], []>} : vector<4x24xf32>, vector<24x32xf32>, vector<4x32xf32> -> vector<4x32xf32>
    %c136 = arith.constant 136 : index
    %c0_15 = arith.constant 0 : index
    %24 = vector.load %arg1[%c136, %c0_15] : memref<352x128xf32, #tpu.memory_space<vmem>>, vector<8x32xf32>
    %cst_16 = arith.constant dense<0.000000e+00> : vector<4x32xf32>
    %25 = tpu.matmul %21, %24, %cst_16 {dimension_numbers = #tpu.dot_dimension_numbers<[1], [0], [0], [1], [0, 0, 1, 1], [], []>} : vector<4x8xf32>, vector<8x32xf32>, vector<4x32xf32> -> vector<4x32xf32>
    %26 = arith.addf %23, %25 : vector<4x32xf32>
    %c144 = arith.constant 144 : index
    %c0_17 = arith.constant 0 : index
    %27 = vector.load %arg1[%c144, %c0_17] : memref<352x128xf32, #tpu.memory_space<vmem>>, vector<1x32xf32>
    %28 = vector.broadcast %27 : vector<1x32xf32> to vector<4x32xf32>
    %29 = arith.addf %26, %28 : vector<4x32xf32>
    %cst_18 = arith.constant 0.000000e+00 : f32
    %30 = vector.broadcast %cst_18 : f32 to vector<4x32xf32>
    %31 = arith.maximumf %29, %30 : vector<4x32xf32>
    %cst_19 = arith.constant dense<0.000000e+00> : vector<32xf32>
    %32 = vector.multi_reduction <add>, %31, %cst_19 [0] : vector<4x32xf32> to vector<32xf32>
    %33 = vector.shape_cast %32 : vector<32xf32> to vector<1x32xf32>
    %34 = arith.mulf %31, %31 : vector<4x32xf32>
    %cst_20 = arith.constant dense<0.000000e+00> : vector<32xf32>
    %35 = vector.multi_reduction <add>, %34, %cst_20 [0] : vector<4x32xf32> to vector<32xf32>
    %36 = vector.shape_cast %35 : vector<32xf32> to vector<1x32xf32>
    %37 = tpu.concatenate %33, %36 in 0 : vector<1x32xf32>, vector<1x32xf32> -> vector<2x32xf32>
    %cst_21 = arith.constant 3.125000e-02 : f32
    %38 = vector.broadcast %cst_21 : f32 to vector<2x32xf32>
    %39 = arith.mulf %37, %38 : vector<2x32xf32>
    %c152 = arith.constant 152 : index
    %c0_22 = arith.constant 0 : index
    %40 = vector.load %arg1[%c152, %c0_22] : memref<352x128xf32, #tpu.memory_space<vmem>>, vector<32x32xf32>
    %cst_23 = arith.constant dense<0.000000e+00> : vector<2x32xf32>
    %41 = tpu.matmul %39, %40, %cst_23 {dimension_numbers = #tpu.dot_dimension_numbers<[1], [0], [0], [1], [0, 0, 1, 1], [], []>} : vector<2x32xf32>, vector<32x32xf32>, vector<2x32xf32> -> vector<2x32xf32>
    %42 = vector.extract_strided_slice %41 {offsets = [0, 0], sizes = [1, 32], strides = [1, 1]} : vector<2x32xf32> to vector<1x32xf32>
    %43 = vector.extract_strided_slice %41 {offsets = [1, 0], sizes = [1, 32], strides = [1, 1]} : vector<2x32xf32> to vector<1x32xf32>
    %44 = arith.mulf %42, %42 : vector<1x32xf32>
    %45 = arith.subf %43, %44 : vector<1x32xf32>
    %46 = vector.broadcast %42 : vector<1x32xf32> to vector<4x32xf32>
    %47 = arith.subf %31, %46 : vector<4x32xf32>
    %cst_24 = arith.constant 9.99999974E-6 : f32
    %48 = vector.broadcast %cst_24 : f32 to vector<1x32xf32>
    %49 = arith.addf %45, %48 : vector<1x32xf32>
    %50 = math.rsqrt %49 : vector<1x32xf32>
    %51 = vector.broadcast %50 : vector<1x32xf32> to vector<4x32xf32>
    %52 = arith.mulf %47, %51 : vector<4x32xf32>
    %c184 = arith.constant 184 : index
    %c0_25 = arith.constant 0 : index
    %53 = vector.load %arg1[%c184, %c0_25] : memref<352x128xf32, #tpu.memory_space<vmem>>, vector<32x64xf32>
    %cst_26 = arith.constant dense<0.000000e+00> : vector<4x64xf32>
    %54 = tpu.matmul %52, %53, %cst_26 {dimension_numbers = #tpu.dot_dimension_numbers<[1], [0], [0], [1], [0, 0, 1, 1], [], []>} : vector<4x32xf32>, vector<32x64xf32>, vector<4x64xf32> -> vector<4x64xf32>
    %c216 = arith.constant 216 : index
    %c0_27 = arith.constant 0 : index
    %55 = vector.load %arg1[%c216, %c0_27] : memref<352x128xf32, #tpu.memory_space<vmem>>, vector<1x64xf32>
    %56 = vector.broadcast %55 : vector<1x64xf32> to vector<4x64xf32>
    %57 = arith.addf %54, %56 : vector<4x64xf32>
    %cst_28 = arith.constant dense<0.000000e+00> : vector<64xf32>
    %58 = vector.multi_reduction <add>, %57, %cst_28 [0] : vector<4x64xf32> to vector<64xf32>
    %59 = vector.shape_cast %58 : vector<64xf32> to vector<1x64xf32>
    %60 = arith.mulf %57, %57 : vector<4x64xf32>
    %cst_29 = arith.constant dense<0.000000e+00> : vector<64xf32>
    %61 = vector.multi_reduction <add>, %60, %cst_29 [0] : vector<4x64xf32> to vector<64xf32>
    %62 = vector.shape_cast %61 : vector<64xf32> to vector<1x64xf32>
    %63 = tpu.concatenate %59, %62 in 0 : vector<1x64xf32>, vector<1x64xf32> -> vector<2x64xf32>
    %cst_30 = arith.constant 3.125000e-02 : f32
    %64 = vector.broadcast %cst_30 : f32 to vector<2x64xf32>
    %65 = arith.mulf %63, %64 : vector<2x64xf32>
    %c224 = arith.constant 224 : index
    %c0_31 = arith.constant 0 : index
    %66 = vector.load %arg1[%c224, %c0_31] : memref<352x128xf32, #tpu.memory_space<vmem>>, vector<64x64xf32>
    %cst_32 = arith.constant dense<0.000000e+00> : vector<2x64xf32>
    %67 = tpu.matmul %65, %66, %cst_32 {dimension_numbers = #tpu.dot_dimension_numbers<[1], [0], [0], [1], [0, 0, 1, 1], [], []>} : vector<2x64xf32>, vector<64x64xf32>, vector<2x64xf32> -> vector<2x64xf32>
    %68 = vector.extract_strided_slice %67 {offsets = [0, 0], sizes = [1, 64], strides = [1, 1]} : vector<2x64xf32> to vector<1x64xf32>
    %69 = vector.extract_strided_slice %67 {offsets = [1, 0], sizes = [1, 64], strides = [1, 1]} : vector<2x64xf32> to vector<1x64xf32>
    %70 = arith.mulf %68, %68 : vector<1x64xf32>
    %71 = arith.subf %69, %70 : vector<1x64xf32>
    %72 = vector.broadcast %68 : vector<1x64xf32> to vector<4x64xf32>
    %73 = arith.subf %57, %72 : vector<4x64xf32>
    %cst_33 = arith.constant 9.99999974E-6 : f32
    %74 = vector.broadcast %cst_33 : f32 to vector<1x64xf32>
    %75 = arith.addf %71, %74 : vector<1x64xf32>
    %76 = math.rsqrt %75 : vector<1x64xf32>
    %77 = vector.broadcast %76 : vector<1x64xf32> to vector<4x64xf32>
    %78 = arith.mulf %73, %77 : vector<4x64xf32>
    %c288 = arith.constant 288 : index
    %c0_34 = arith.constant 0 : index
    %79 = vector.load %arg1[%c288, %c0_34] : memref<352x128xf32, #tpu.memory_space<vmem>>, vector<64x128xf32>
    %cst_35 = arith.constant dense<0.000000e+00> : vector<4x128xf32>
    %80 = tpu.matmul %78, %79, %cst_35 {dimension_numbers = #tpu.dot_dimension_numbers<[1], [0], [0], [1], [0, 0, 1, 1], [], []>} : vector<4x64xf32>, vector<64x128xf32>, vector<4x128xf32> -> vector<4x128xf32>
    %c0_36 = arith.constant 0 : index
    %c0_37 = arith.constant 0 : index
    %81 = vector.load %arg2[%c0_36, %c0_37] : memref<4x128xf32, #tpu.memory_space<vmem>>, vector<4x128xf32>
    tpu.vector_store %arg2[%c0_36, %c0_37], %80 {strides = array<i32>} : memref<4x128xf32, #tpu.memory_space<vmem>>, vector<4x128xf32>,
    return
  }
}

</mosaic_0001>

<bundles_post_ra>
// kernel: forward.1
= control target key start
LH: loop header
LB: loop body
LE: loop exit
PB: predicated region body
PF: predicated region fallthrough
CT: control target
= control target key end

     0   :  { %7 = vsyncpa [#allocation3], 0  ;;  %s1212_s0 = inlined_call_operand.hbm [shape: f32[4,24], index: 0, kind: input, shape index: {}]   ;;  %s1213_s1 = inlined_call_operand.hbm [shape: f32[352,128], index: 1, kind: input, shape index: {}]   ;;  %s1214_s2 = inlined_call_operand.hbm [shape: f32[4,128], index: 2, kind: output, shape index: {}]  }
   0x1   :  { %8 = vsyncpa [#allocation6], 0 }
   0x2   :  { %9 = vsyncpa [#allocation4], 0  ;;  %s1098_s9 = smov [#allocation2]   ;;  %s1099_s11 = smov [#allocation5]  }
   0x3   :  { %s16_s10 = sshll.u32 %s1098_s9, 4  ;;  %s25_s12 = sshll.u32 %s1099_s11, 4  ;;  %s17_s10 = int_to_ptr.vmem [resolvable:$true] %s16_s10  ;;  %s26_s12 = int_to_ptr.vmem [resolvable:$true] %s25_s12 }
   0x4   :  { %s1040_s13 = scalar_lea.vmem %s17_s10, 64  ;;  %p1045_p1 = scmp.lt.s32.totalorder %s17_s10, %s17_s10 }
   0x5   :  { %p1041_p0 = scmp.ne.s32.totalorder %s17_s10, %s1040_s13  ;;  %p1046_p2 = scmp.lt.s32.totalorder %s1040_s13, %s1040_s13 }
   0x7   :  { %p1047_p3 = por %p1046_p2, %p1045_p1 }
   0x9   :  { %p1048_p4 = pnand %p1047_p3, %p1041_p0 }
   0xb   :  { %1051 = shalt.err (!%p1048_p4)
}
   0xc   :  { %19 = dma.hbm_to_vmem [thread:$0]  %s1212_s0, 64, %s17_s10, [#allocation3]  }
   0xd   :  { %s1060_s16 = scalar_lea.vmem %s26_s12, 5632  ;;  %p1065_p6 = scmp.lt.s32.totalorder %s26_s12, %s26_s12 }
   0xe   :  { %p1061_p5 = scmp.ne.s32.totalorder %s26_s12, %s1060_s16  ;;  %p1066_p7 = scmp.lt.s32.totalorder %s1060_s16, %s1060_s16 }
  0x10   :  { %p1067_p8 = por %p1066_p7, %p1065_p6 }
  0x12   :  { %p1068_p9 = pnand %p1067_p8, %p1061_p5 }
  0x14   :  { %1071 = shalt.err (!%p1068_p9)
}
  0x15   :  { %s1100_s17 = smov 128   ;;  %s1101_s18 = smov 8  }
  0x16   :  { %31 = dma.hbm_to_vmem [thread:$0]  %s1213_s1, 5632, %s26_s12, [#allocation6], %s1100_s17, %s1100_s17, %s1101_s18  }
  0x17   :  { %1092 = dma.done.wait [#allocation3], 64  }
  0x18   :  { %1093 = vsyncadd [#allocation3], 4294967232 }
  0x19   :  { %1094 = dma.done.wait [#allocation6], 5632  }
  0x1a   :  { %1095 = vsyncadd [#allocation6], 4294961664  ;;  %v1102_v0 = vmov 0.0   ;;  %vm1103_vm0 = vmmov 0   ;;  %v41_v1 = vld [vmem:[#allocation5 + $0x10] sm:$0xff]  ;;  %v40_v2 = vld [vmem:[#allocation5 + $0x8] sm:$0xff] }
  0x1b   :  { %916 = vmatprep.subr.mxu0 %v1102_v0  ;;  %922 = vmatprep.mubr.msk.f32.mxu0 %vm1103_vm0, %v1102_v0  ;;  %v125_v3 = vld [vmem:[#allocation5 + $0x38] sm:$0xff]  ;;  %v39_v4 = vld [vmem:[#allocation5] sm:$0xff]  ;;  %vm47_vm1 = vcmask 195584   ;;  %v124_v6 = vld [vmem:[#allocation5 + $0x30] sm:$0xff]  ;;  %vm131_vm2 = vcmask 261120   ;;  %vm293_vm3 = vcmask 64512  }
  0x1c   :  { %925 = vmatprep.subr.mxu1 %v1102_v0  ;;  %933 = vmatprep.mubr.msk.f32.mxu1 %vm1103_vm0, %v1102_v0  ;;  %v1133_v5 = vld [vmem:[#allocation2] sm:$0xf]  ;;  %v123_v7 = vld [vmem:[#allocation5 + $0x28] sm:$0xff]  ;;  %v122_v8 = vld [vmem:[#allocation5 + $0x20] sm:$0xff]  ;;  %vm444_vm4 = vcmask 257024   ;;  %vm460_vm5 = vcmask 1040384  }
  0x1d   :  { %917 = vmatpush3.msra.mxu0 %v41_v1  ;;  %926 = vmatpush3.msra.mxu1 %v125_v3  ;;  %v209_v9 = vld [vmem:[#allocation5 + $0x60] sm:$0xff]  ;;  %v854_v10 = vld [vmem:[#allocation5 + $0x18] ss:$0 sm:$0xff]  ;;  %v207_v16 = vld [vmem:[#allocation5 + $0x50] sm:$0xff]  ;;  %vm639_vm6 = vcmask 519168   ;;  %vm665_vm7 = vcmask 523264  }
  0x1e   :  { %918 = vmatprep.subr.mxu0 %v1102_v0  ;;  %927 = vmatprep.subr.mxu1 %v1102_v0  ;;  %v208_v15 = vld [vmem:[#allocation5 + $0x58] sm:$0xff]  ;;  %v206_v17 = vld [vmem:[#allocation5 + $0x48] sm:$0xff]  ;;  %v856_v18 = vld [vmem:[#allocation5 + $0x40] ss:$0 sm:$0xff]  ;;  %s1104_s0 = smov [#allocation7]  }
  0x1f   :  { %919 = vmatpush3.msra.mxu0 %v40_v2  ;;  %928 = vmatpush3.msra.mxu1 %v124_v6  ;;  %v292_v23 = vld [vmem:[#allocation5 + $0x88] sm:$0xff]  ;;  %v291_v29 = vld [vmem:[#allocation5 + $0x80] sm:$0xff]  ;;  %v290_v30 = vld [vmem:[#allocation5 + $0x78] sm:$0xff]  ;;  %s844_s1 = sshll.u32 %s1104_s0, 4  ;;  %s845_s1 = int_to_ptr.vmem [resolvable:$true] %s844_s1 }
  0x20   :  { %920 = vmatprep.subr.mxu0 %v1102_v0  ;;  %929 = vmatprep.subr.mxu1 %v1102_v0  ;;  %v858_v24 = vld [vmem:[#allocation5 + $0x68] ss:$0 sm:$0xff]  ;;  %v289_v31 = vld [vmem:[#allocation5 + $0x70] sm:$0xff]  ;;  %v464_v34 = vld [vmem:[#allocation5 + $0xa0] sm:$0xff]  ;;  %s1072_s21 = scalar_lea.vmem %s845_s1, 64  ;;  %p1077_p11 = scmp.lt.s32.totalorder %s845_s1, %s845_s1 }
  0x21   :  { %921 = vmatpush3.msra.mxu0 %v39_v4  ;;  %930 = vmatpush3.msra.mxu1 %v123_v7  ;;  %v466_v32 = vld [vmem:[#allocation5 + $0xb0] sm:$0xff]  ;;  %v465_v33 = vld [vmem:[#allocation5 + $0xa8] sm:$0xff]  ;;  %v463_v35 = vld [vmem:[#allocation5 + $0x98] sm:$0xff]  ;;  %v545_v7 = vlaneseq  ;;  %p1073_p10 = scmp.ne.s32.totalorder %s845_s1, %s1072_s21  ;;  %p1078_p12 = scmp.lt.s32.totalorder %s1072_s21, %s1072_s21 }
  0x22   :  { %923 = vmatmul.mubr.msk.f32.vlgmr.msra.gmra.mxu0 %vm47_vm1, %v1133_v5  ;;  %936 = vmatprep.subr.mxu0 %v1102_v0  ;;  %v862_v39 = vld [vmem:[#allocation5 + $0x90] ss:$0 sm:$0xff]  ;;  %v559_v62 = vld [vmem:[#allocation5 + $0xc8] sm:$0xff]  ;;  %v558_v63 = vld [vmem:[#allocation5 + $0xc0] sm:$0xff] }
  0x23   :  { %944 = vmatprep.mubr.msk.f32.mxu0 %vm1103_vm0, %v1102_v0  ;;  %931 = vmatprep.subr.mxu1 %v1102_v0  ;;  %v560_v61 = vld [vmem:[#allocation5 + $0xd0] sm:$0xff]  ;;  %v557_v1 = vld [vmem:[#allocation5 + $0xb8] sm:$0xff]  ;;  %p1079_p13 = por %p1078_p12, %p1077_p11 }
  0x24   :  { %932 = vmatpush3.msra.mxu1 %v122_v8  ;;  %937 = vmatpush3.msra.mxu0 %v209_v9  ;;  %v1177_v9 = vshrl.u32 %v545_v7, 7 }
  0x25   :  { %947 = vmatprep.subr.mxu1 %v1102_v0  ;;  %938 = vmatprep.subr.mxu0 %v1102_v0  ;;  %p1080_p0 = pnand %p1079_p13, %p1073_p10 }
  0x26   :  { %939 = vmatpush3.msra.mxu0 %v208_v15 }
  0x27   :  { %940 = vmatprep.subr.mxu0 %v1102_v0 }
  0x28   :  { %941 = vmatpush3.msra.mxu0 %v207_v16 }
  0x29   :  { %942 = vmatprep.subr.mxu0 %v1102_v0 }
  0x2a   :  { %943 = vmatpush3.msra.mxu0 %v206_v17  ;;  %v664_v17 = vld [vmem:[#allocation5 + $0x118] sm:$0xff] }
  0x2b   :  { %961 = vmatprep.subr.mxu0 %v1102_v0 }
  0xe2   :  { %v117_v11 = vpop.f32.mrf.mxu0 }
  0xe3   :  { %v118_v12 = vadd.f32 %v854_v10, %v117_v11  ;;  %v547_v10 = vsub.s32 0, %v1177_v9 }
  0xe4   :  { %v924_v13 = vpop.f32.mrf.mxu0 }
  0xe5   :  { %v121_v14 = vmax.f32 %v118_v12, 0.0  ;;  %v554_v12 = vsub.s32 1, %v1177_v9 }
  0xe7   :  { %934 = vmatmul.mubr.msk.f32.vlgmr.msra.gmra.mxu1 %vm131_vm2, %v121_v14 }
  0xe8   :  { %949 = vmatprep.mubr.msk.f32.mxu1 %vm1103_vm0, %v1102_v0  ;;  %948 = vmatpush3.msra.mxu1 %v292_v23  ;;  %v658_v23 = vld [vmem:[#allocation5 + $0xe8] sm:$0xff] }
  0xe9   :  { %952 = vmatprep.subr.mxu1 %v1102_v0 }
 0x1a7   :  { %v201_v19 = vpop.f32.mrf.mxu1 }
 0x1a8   :  { %v202_v20 = vadd.f32 %v856_v18, %v201_v19  ;;  %v663_v18 = vld [vmem:[#allocation5 + $0x110] sm:$0xff]  ;;  %v662_v19 = vld [vmem:[#allocation5 + $0x108] sm:$0xff] }
 0x1a9   :  { %v935_v21 = vpop.f32.mrf.mxu1 }
 0x1aa   :  { %v205_v22 = vmax.f32 %v202_v20, 0.0  ;;  %v661_v20 = vld [vmem:[#allocation5 + $0x100] sm:$0xff]  ;;  %v660_v21 = vld [vmem:[#allocation5 + $0xf8] sm:$0xff] }
 0x1ac   :  { %945 = vmatmul.mubr.msk.f32.vlgmr.msra.gmra.mxu0 %vm131_vm2, %v205_v22  ;;  %v659_v22 = vld [vmem:[#allocation5 + $0xf0] sm:$0xff] }
 0x1ad   :  { %969 = vmatprep.mubr.msk.f32.mxu0 %vm1103_vm0, %v1102_v0  ;;  %962 = vmatpush3.msra.mxu0 %v466_v32 }
 0x1ae   :  { %963 = vmatprep.subr.mxu0 %v1102_v0 }
 0x1af   :  { %964 = vmatpush3.msra.mxu0 %v465_v33 }
 0x1b0   :  { %965 = vmatprep.subr.mxu0 %v1102_v0 }
 0x1b1   :  { %966 = vmatpush3.msra.mxu0 %v464_v34 }
 0x1b2   :  { %967 = vmatprep.subr.mxu0 %v1102_v0 }
 0x1b3   :  { %968 = vmatpush3.msra.mxu0 %v463_v35 }
 0x1b4   :  { %983 = vmatprep.subr.mxu0 %v1102_v0 }
 0x26c   :  { %v284_v25 = vpop.f32.mrf.mxu0 }
 0x26d   :  { %v285_v26 = vadd.f32 %v858_v24, %v284_v25  ;;  %v657_v24 = vld [vmem:[#allocation5 + $0xe0] sm:$0xff]  ;;  %v864_v25 = vld [vmem:[#allocation5 + $0xd8] ss:$0 sm:$0xff] }
 0x26e   :  { %v946_v27 = vpop.f32.mrf.mxu0 }
 0x26f   :  { %v288_v28 = vmax.f32 %v285_v26, 0.0 }
 0x271   :  { %950 = vmatmul.mubr.msk.f32.vlgmr.msra.gmra.mxu1 %vm293_vm3, %v288_v28 }
 0x272   :  { %953 = vmatpush3.msra.mxu1 %v291_v29  ;;  %958 = vmatprep.mubr.msk.f32.mxu1 %vm1103_vm0, %v1102_v0 }
 0x273   :  { %954 = vmatprep.subr.mxu1 %v1102_v0 }
 0x274   :  { %955 = vmatpush3.msra.mxu1 %v290_v30 }
 0x275   :  { %956 = vmatprep.subr.mxu1 %v1102_v0 }
 0x276   :  { %957 = vmatpush3.msra.mxu1 %v289_v31 }
 0x277   :  { %959 = vmatmul.mubr.msk.f32.vlgmr.msra.gmra.mxu1 %vm47_vm1, %v1133_v5  ;;  %972 = vmatprep.subr.mxu1 %v1102_v0 }
 0x278   :  { %980 = vmatprep.mubr.msk.f32.mxu1 %vm1103_vm0, %v1102_v0  ;;  %973 = vmatpush3.msra.mxu1 %v560_v61 }
 0x279   :  { %974 = vmatprep.subr.mxu1 %v1102_v0 }
 0x27a   :  { %975 = vmatpush3.msra.mxu1 %v559_v62 }
 0x27b   :  { %976 = vmatprep.subr.mxu1 %v1102_v0 }
 0x27c   :  { %977 = vmatpush3.msra.mxu1 %v558_v63 }
 0x27d   :  { %978 = vmatprep.subr.mxu1 %v1102_v0 }
 0x27e   :  { %979 = vmatpush3.msra.mxu1 %v557_v1 }
 0x27f   :  { %1002 = vmatprep.subr.mxu1 %v1102_v0 }
 0x331   :  { %v363_v36 = vpop.f32.mrf.mxu1 }
 0x333   :  { %v951_v37 = vpop.f32.mrf.mxu1 }
 0x337   :  { %v433_v38 = vpop.f32.mrf.mxu1 }
 0x338   :  { %v434_v40 = vadd.f32 %v433_v38, %v363_v36 }
 0x339   :  { %v960_v41 = vpop.f32.mrf.mxu1 }
 0x33a   :  { %v442_v42 = vadd.f32 %v862_v39, %v434_v40 }
 0x33c   :  { %v443_v43 = vmax.f32 %v442_v42, 0.0 }
 0x33e   :  { %v445_v44 = vsel %vm444_vm4, %v443_v43, 0.0  ;;  %v452_v45 = vmul.f32 %v443_v43, %v443_v43 }
 0x33f   :  { %v446_v46 = vrot.slane %v445_v44, 4 }
 0x340   :  { %v453_v47 = vsel %vm444_vm4, %v452_v45, 0.0 }
 0x341   :  { %v447_v48 = vadd.f32 %v446_v46, %v445_v44  ;;  %v454_v49 = vrot.slane %v453_v47, 4  ;;  %v763_v46 = vld [vmem:[#allocation5 + $0x158] sm:$0xff] }
 0x343   :  { %v448_v50 = vrot.slane %v447_v48, 2  ;;  %v455_v51 = vadd.f32 %v454_v49, %v453_v47  ;;  %v762_v47 = vld [vmem:[#allocation5 + $0x150] sm:$0xff]  ;;  %v760_v49 = vld [vmem:[#allocation5 + $0x140] sm:$0xff] }
 0x345   :  { %v449_v52 = vadd.f32 %v448_v50, %v447_v48  ;;  %v456_v53 = vrot.slane %v455_v51, 2  ;;  %v761_v48 = vld [vmem:[#allocation5 + $0x148] sm:$0xff]  ;;  %v759_v50 = vld [vmem:[#allocation5 + $0x138] sm:$0xff] }
 0x347   :  { %v450_v54 = vrot.slane %v449_v52, 1  ;;  %v457_v55 = vadd.f32 %v456_v53, %v455_v51  ;;  %v758_v51 = vld [vmem:[#allocation5 + $0x130] sm:$0xff]  ;;  %v756_v53 = vld [vmem:[#allocation5 + $0x120] sm:$0xff] }
 0x349   :  { %v458_v56 = vrot.slane %v457_v55, 1  ;;  %v451_v57 = vadd.f32 %v450_v54, %v449_v52  ;;  %v757_v52 = vld [vmem:[#allocation5 + $0x128] sm:$0xff] }
 0x34b   :  { %v459_v58 = vadd.f32 %v458_v56, %v457_v55 }
 0x34d   :  { %v461_v59 = vsel %vm460_vm5, %v451_v57, %v459_v58 }
 0x34e   :  { %v462_v60 = vmul.f32 0.03125, %v461_v59 }
 0x350   :  { %970 = vmatmul.mubr.msk.f32.vlgmr.msra.gmra.mxu0 %vm131_vm2, %v462_v60 }
 0x351   :  { %999 = vmatprep.mubr.msk.f32.mxu0 %vm1103_vm0, %v1102_v0  ;;  %984 = vmatpush3.msra.mxu0 %v664_v17 }
 0x352   :  { %985 = vmatprep.subr.mxu0 %v1102_v0 }
 0x353   :  { %986 = vmatpush3.msra.mxu0 %v663_v18 }
 0x354   :  { %987 = vmatprep.subr.mxu0 %v1102_v0 }
 0x355   :  { %988 = vmatpush3.msra.mxu0 %v662_v19 }
 0x356   :  { %989 = vmatprep.subr.mxu0 %v1102_v0 }
 0x357   :  { %990 = vmatpush3.msra.mxu0 %v661_v20 }
 0x358   :  { %991 = vmatprep.subr.mxu0 %v1102_v0 }
 0x359   :  { %992 = vmatpush3.msra.mxu0 %v660_v21 }
 0x35a   :  { %993 = vmatprep.subr.mxu0 %v1102_v0 }
 0x35b   :  { %994 = vmatpush3.msra.mxu0 %v659_v22 }
 0x35c   :  { %995 = vmatprep.subr.mxu0 %v1102_v0 }
 0x35d   :  { %996 = vmatpush3.msra.mxu0 %v658_v23 }
 0x35e   :  { %997 = vmatprep.subr.mxu0 %v1102_v0 }
 0x35f   :  { %998 = vmatpush3.msra.mxu0 %v657_v24 }
 0x410   :  { %v536_v2 = vpop.f32.mrf.mxu0 }
 0x411   :  { %v540_v3 = vmul.f32 %v536_v2, %v536_v2  ;;  %v548_v11 = vrot.slane %v536_v2, %v547_v10 }
 0x412   :  { %v971_v4 = vpop.f32.mrf.mxu0 }
 0x413   :  { %v542_v5 = vrot.slane %v540_v3, 7  ;;  %v549_v14 = vsub.f32 %v443_v43, %v548_v11 }
 0x415   :  { %v544_v6 = vsub.f32 %v536_v2, %v542_v5 }
 0x417   :  { %v550_v8 = vadd.f32 1e-05, %v544_v6 }
 0x419   :  { %1028 = vrsqrt.f32 %v550_v8 }
 0x426   :  { %v1029_v13 = vpop.eup %1028 }
 0x427   :  { %v555_v15 = vrot.slane %v1029_v13, %v554_v12 }
 0x429   :  { %v556_v16 = vmul.f32 %v555_v15, %v549_v14 }
 0x42b   :  { %981 = vmatmul.mubr.msk.f32.vlgmr.msra.gmra.mxu1 %vm131_vm2, %v556_v16 }
 0x42c   :  { %1018 = vmatprep.mubr.msk.f32.mxu1 %vm1103_vm0, %v1102_v0  ;;  %1003 = vmatpush3.msra.mxu1 %v763_v46 }
 0x42d   :  { %1004 = vmatprep.subr.mxu1 %v1102_v0 }
 0x42e   :  { %1005 = vmatpush3.msra.mxu1 %v762_v47 }
 0x42f   :  { %1006 = vmatprep.subr.mxu1 %v1102_v0 }
 0x430   :  { %1007 = vmatpush3.msra.mxu1 %v761_v48 }
 0x431   :  { %1008 = vmatprep.subr.mxu1 %v1102_v0 }
 0x432   :  { %1009 = vmatpush3.msra.mxu1 %v760_v49 }
 0x433   :  { %1010 = vmatprep.subr.mxu1 %v1102_v0 }
 0x434   :  { %1011 = vmatpush3.msra.mxu1 %v759_v50 }
 0x435   :  { %1012 = vmatprep.subr.mxu1 %v1102_v0 }
 0x436   :  { %1013 = vmatpush3.msra.mxu1 %v758_v51 }
 0x437   :  { %1014 = vmatprep.subr.mxu1 %v1102_v0 }
 0x438   :  { %1015 = vmatpush3.msra.mxu1 %v757_v52 }
 0x439   :  { %1016 = vmatprep.subr.mxu1 %v1102_v0 }
 0x43a   :  { %1017 = vmatpush3.msra.mxu1 %v756_v53 }
 0x4eb   :  { %v635_v26 = vpop.f32.mrf.mxu1 }
 0x4ec   :  { %v636_v27 = vadd.f32 %v864_v25, %v635_v26 }
 0x4ed   :  { %v982_v28 = vpop.f32.mrf.mxu1 }
 0x4ee   :  { %v640_v29 = vsel %vm639_vm6, %v636_v27, 0.0  ;;  %v647_v30 = vmul.f32 %v636_v27, %v636_v27 }
 0x4ef   :  { %v641_v31 = vrot.slane %v640_v29, 4 }
 0x4f0   :  { %v648_v32 = vsel %vm639_vm6, %v647_v30, 0.0 }
 0x4f1   :  { %v642_v33 = vadd.f32 %v641_v31, %v640_v29  ;;  %v649_v34 = vrot.slane %v648_v32, 4 }
 0x4f3   :  { %v643_v35 = vrot.slane %v642_v33, 2  ;;  %v650_v36 = vadd.f32 %v649_v34, %v648_v32 }
 0x4f5   :  { %v644_v37 = vadd.f32 %v643_v35, %v642_v33  ;;  %v651_v38 = vrot.slane %v650_v36, 2 }
 0x4f7   :  { %v645_v39 = vrot.slane %v644_v37, 1  ;;  %v652_v40 = vadd.f32 %v651_v38, %v650_v36 }
 0x4f9   :  { %v653_v41 = vrot.slane %v652_v40, 1  ;;  %v646_v42 = vadd.f32 %v645_v39, %v644_v37 }
 0x4fb   :  { %v654_v43 = vadd.f32 %v653_v41, %v652_v40 }
 0x4fd   :  { %v655_v44 = vsel %vm460_vm5, %v646_v42, %v654_v43 }
 0x4fe   :  { %v656_v45 = vmul.f32 0.03125, %v655_v44 }
 0x500   :  { %1000 = vmatmul.mubr.msk.f32.vlgmr.msra.gmra.mxu0 %vm665_vm7, %v656_v45 }
 0x5c0   :  { %v735_v54 = vpop.f32.mrf.mxu0 }
 0x5c1   :  { %v739_v55 = vmul.f32 %v735_v54, %v735_v54  ;;  %v747_v60 = vrot.slane %v735_v54, %v547_v10 }
 0x5c2   :  { %v1001_v56 = vpop.f32.mrf.mxu0 }
 0x5c3   :  { %v741_v57 = vrot.slane %v739_v55, 7  ;;  %v748_v62 = vsub.f32 %v636_v27, %v747_v60 }
 0x5c5   :  { %v743_v58 = vsub.f32 %v735_v54, %v741_v57 }
 0x5c7   :  { %v749_v59 = vadd.f32 1e-05, %v743_v58 }
 0x5c9   :  { %1030 = vrsqrt.f32 %v749_v59 }
 0x5d6   :  { %v1031_v61 = vpop.eup %1030 }
 0x5d7   :  { %v754_v63 = vrot.slane %v1031_v61, %v554_v12 }
 0x5d9   :  { %v755_v1 = vmul.f32 %v754_v63, %v748_v62 }
 0x5db   :  { %1019 = vmatmul.mubr.msk.f32.vlgmr.msra.gmra.mxu1 %vm665_vm7, %v755_v1 }
 0x69b   :  { %v833_v0 = vpop.f32.mrf.mxu1 }
 0x69c   :  { %837 = vst [vmem:[#allocation7] sm:$0xf] %v833_v0 }
 0x69d   :  { %v1020_v2 = vpop.f32.mrf.mxu1 }
 0x69e   :  { %1083 = shalt.err (!%p1080_p0)
}
 0x69f   :  { %847 = dma.vmem_to_hbm [thread:$0]  %s845_s1, 64, %s1214_s2, [#allocation4]  }
 0x6a0   :  { %1096 = dma.done.wait [#allocation4], 64  }
 0x6a1   :  { %1097 = vsyncadd [#allocation4], 4294967232 }
 0x6a2   :  { %851 = vsyncpa [#allocation3], 1 }
 0x6a3   :  { %852 = vsyncpa [#allocation6], 1 }
 0x6a4   :  { %853 = vsyncpa [#allocation4], 1 }

</bundles_post_ra>
